<compile_context>
chip_gen: v5e
topology: v5e:2x2
jax: 0.10.0
libtpu: 0.0.40
codegen_flags: <defaults>
</compile_context>

<pallas_src>
import math
import jax
import jax.numpy as jnp
from jax.experimental import pallas as pl
from jax.experimental.pallas import tpu as pltpu


# ---------------------------------------------------------------------------
# Pallas kernels
# ---------------------------------------------------------------------------
def _fused_svd_conv_kernel(p_ref, wf_ref, b_ref, o_ref):
    # p_ref:  (K, tm)   bf16 im2col patches tile (spatial along lanes)
    # wf_ref: (Co, K)   bf16 fused weight W_U @ W_V
    # b_ref:  (Co, 1)   f32 bias
    # o_ref:  (Co, tm)
    acc = jnp.dot(wf_ref[...], p_ref[...], preferred_element_type=jnp.float32)
    o_ref[...] = (acc + b_ref[...]).astype(o_ref.dtype)


def _factored_svd_conv_kernel(p_ref, wv_ref, wu_ref, b_ref, o_ref):
    # p_ref:  (K, tm)   bf16 patches tile
    # wv_ref: (Cv, K)   bf16 conv2d_V weight
    # wu_ref: (Co, Cv)  bf16 conv2d_U (1x1) weight
    # b_ref:  (Co, 1)   f32 bias
    # o_ref:  (Co, tm)
    mid = jnp.dot(wv_ref[...], p_ref[...], preferred_element_type=jnp.float32)
    acc = jnp.dot(wu_ref[...], mid.astype(wu_ref.dtype),
                  preferred_element_type=jnp.float32)
    o_ref[...] = (acc + b_ref[...]).astype(o_ref.dtype)


# ---------------------------------------------------------------------------
# Wrapper
# ---------------------------------------------------------------------------
def _round_up(a, b):
    return -(-a // b) * b


def conv2d_orth_v2_forward(x, weight_V, weight_U, bias, stride, padding,
                           compute_dtype=jnp.bfloat16):
    """x: (B, Cin, H, W) NCHW; weight_V: (Cv, Cin, kh, kw); weight_U: (Co, Cv, 1, 1)."""
    B, Cin, H, W = x.shape
    Cv, _, kh, kw = weight_V.shape
    Co = weight_U.shape[0]
    sh, sw = stride
    ph, pw = padding
    OH = (H + 2 * ph - kh) // sh + 1
    OW = (W + 2 * pw - kw) // sw + 1
    K = Cin * kh * kw
    Mb = OH * OW                      # spatial size per batch element
    out_dtype = x.dtype

    # --- glue: im2col in compute dtype, batch-major (B, K, Mb); pure reshape,
    # no large transpose (the kernel writes batch-major output directly). -----
    xp = jnp.pad(x.astype(compute_dtype), ((0, 0), (0, 0), (ph, ph), (pw, pw)))
    cols = [xp[:, :, i:i + sh * OH:sh, j:j + sw * OW:sw]
            for i in range(kh) for j in range(kw)]            # each (B,Cin,OH,OW)
    patches = jnp.stack(cols, axis=2).reshape(B, K, Mb)        # (B, K, Mb)

    wv2d = weight_V.reshape(Cv, K).astype(jnp.float32)
    wu2d = weight_U.reshape(Co, Cv).astype(jnp.float32)
    if bias is None:
        bias = jnp.zeros((Co,), jnp.float32)
    b2d = bias.reshape(Co, 1).astype(jnp.float32)

    fused = (Cv == Co)   # low-rank factorization only pays off when Cv < Co

    # --- tile sizing: largest lane-tile within a generation-safe VMEM budget ---
    in_b = jnp.dtype(compute_dtype).itemsize
    out_b = jnp.dtype(out_dtype).itemsize
    per_col = 2 * K * in_b + 2 * Co * out_b + (0 if fused else 4 * Cv)
    budget = 32 * 1024 * 1024                 # safe inside v7x's 64 MiB VMEM
    tm = max(128, min(2048, (budget // per_col) // 128 * 128))
    tm = min(tm, _round_up(Mb, 128))
    if B == 1:
        # keep >= 2 grid steps when possible (pipelining + both v7x TCs)
        tm = min(tm, max(128, _round_up(Mb, 256) // 2))
    Mb_pad = _round_up(Mb, tm)
    if Mb_pad != Mb:
        patches = jnp.pad(patches, ((0, 0), (0, 0), (0, Mb_pad - Mb)))
    grid = (B, Mb_pad // tm)

    cparams = pltpu.CompilerParams(
        dimension_semantics=("parallel", "parallel"),
        vmem_limit_bytes=48 * 1024 * 1024,
    )

    if fused:
        wf = jnp.dot(wu2d, wv2d,
                     preferred_element_type=jnp.float32).astype(compute_dtype)
        out_t = pl.pallas_call(
            _fused_svd_conv_kernel,
            out_shape=jax.ShapeDtypeStruct((B, Co, Mb_pad), out_dtype),
            grid_spec=pltpu.PrefetchScalarGridSpec(
                num_scalar_prefetch=0,
                grid=grid,
                in_specs=[
                    pl.BlockSpec((None, K, tm), lambda b, i: (b, 0, i)),
                    pl.BlockSpec((Co, K), lambda b, i: (0, 0)),
                    pl.BlockSpec((Co, 1), lambda b, i: (0, 0)),
                ],
                out_specs=pl.BlockSpec((None, Co, tm), lambda b, i: (b, 0, i)),
            ),
            compiler_params=cparams,
        )(patches, wf, b2d)
    else:
        wv_c = wv2d.astype(compute_dtype)
        wu_c = wu2d.astype(compute_dtype)
        out_t = pl.pallas_call(
            _factored_svd_conv_kernel,
            out_shape=jax.ShapeDtypeStruct((B, Co, Mb_pad), out_dtype),
            grid_spec=pltpu.PrefetchScalarGridSpec(
                num_scalar_prefetch=0,
                grid=grid,
                in_specs=[
                    pl.BlockSpec((None, K, tm), lambda b, i: (b, 0, i)),
                    pl.BlockSpec((Cv, K), lambda b, i: (0, 0)),
                    pl.BlockSpec((Co, Cv), lambda b, i: (0, 0)),
                    pl.BlockSpec((Co, 1), lambda b, i: (0, 0)),
                ],
                out_specs=pl.BlockSpec((None, Co, tm), lambda b, i: (b, 0, i)),
            ),
            compiler_params=cparams,
        )(patches, wv_c, wu_c, b2d)

    # already batch-major -> only a cheap slice + reshape, no transpose
    out = out_t[:, :, :Mb].reshape(B, Co, OH, OW)
    return out


# ---------------------------------------------------------------------------
# Parameter construction mirroring Conv2d_Orth_v2.__init__ (SVD factorization)
# ---------------------------------------------------------------------------
def make_orth_params(key, ichnls, ochnls, sz_kern):
    kh, kw = sz_kern
    K = ichnls * kh * kw
    v_ochnls = min(K, ochnls)
    kw_key, kb_key = jax.random.split(key)
    bound = 1.0 / math.sqrt(K)
    weight_2d = jax.random.uniform(kw_key, (ochnls, K), jnp.float32, -bound, bound)
    bias = jax.random.uniform(kb_key, (ochnls,), jnp.float32, -bound, bound)
    U, s, Vh = jnp.linalg.svd(weight_2d, full_matrices=False)   # U:(Co,Cv) s:(Cv,) Vh:(Cv,K)
    sqrt_s = jnp.sqrt(s)
    U_s = U * sqrt_s                     # t_U * sqrt(t_s)
    V_s_T = sqrt_s[:, None] * Vh         # (t_V * sqrt(t_s)).T
    weight_V = V_s_T.reshape(v_ochnls, ichnls, kh, kw)
    weight_U = U_s.reshape(ochnls, v_ochnls, 1, 1)
    return weight_V, weight_U, bias


def _reference_forward(x, weight_V, weight_U, bias, stride, padding):
    ph, pw = padding
    mid = jax.lax.conv_general_dilated(
        x, weight_V, window_strides=stride,
        padding=[(ph, ph), (pw, pw)],
        dimension_numbers=("NCHW", "OIHW", "NCHW"))
    out = jax.lax.conv_general_dilated(
        mid, weight_U, window_strides=(1, 1), padding="VALID",
        dimension_numbers=("NCHW", "OIHW", "NCHW"))
    return out + bias[None, :, None, None]


if __name__ == "__main__":
    key = jax.random.PRNGKey(0)

    # --- Test 1: Cv == Co  -> fused single-matmul path ---------------------
    B, Cin, H, W = 2, 4, 16, 16
    Co = 8
    sz_kern, stride, padding = (3, 3), (1, 1), (1, 1)
    k1, k2, key = jax.random.split(key, 3)
    x = jax.random.normal(k1, (B, Cin, H, W), jnp.float32)
    wV, wU, b = make_orth_params(k2, Cin, Co, sz_kern)

    out = jax.block_until_ready(
        conv2d_orth_v2_forward(x, wV, wU, b, stride, padding))
    ref = jax.block_until_ready(_reference_forward(x, wV, wU, b, stride, padding))
    assert out.shape == (B, Co, H, W), out.shape
    assert jnp.allclose(out, ref, rtol=5e-2, atol=5e-2), \
        float(jnp.max(jnp.abs(out - ref)))

    # --- Test 2: Cv < Co  -> factored two-matmul path -----------------------
    B2, Cin2, H2, W2 = 2, 1, 16, 16
    Co2 = 16
    k3, k4, key = jax.random.split(key, 3)
    x2 = jax.random.normal(k3, (B2, Cin2, H2, W2), jnp.float32)
    wV2, wU2, b2 = make_orth_params(k4, Cin2, Co2, sz_kern)

    out2 = jax.block_until_ready(
        conv2d_orth_v2_forward(x2, wV2, wU2, b2, stride, padding))
    ref2 = jax.block_until_ready(
        _reference_forward(x2, wV2, wU2, b2, stride, padding))
    assert out2.shape == (B2, Co2, H2, W2), out2.shape
    assert jnp.allclose(out2, ref2, rtol=5e-2, atol=5e-2), \
        float(jnp.max(jnp.abs(out2 - ref2)))

    print("KERNEL_OK")
</pallas_src>

<mosaic_0001>
module attributes {stable_mosaic.version = 11 : i64} {
  func.func @_fused_svd_conv_kernel(%arg0: i32, %arg1: i32, %arg2: memref<1x36x256xbf16, #tpu.memory_space<vmem>>, %arg3: memref<8x36xbf16, #tpu.memory_space<vmem>>, %arg4: memref<8x1xf32, #tpu.memory_space<vmem>>, %arg5: memref<1x8x256xf32, #tpu.memory_space<vmem>>) attributes {dimension_semantics = [#tpu.dimension_semantics<parallel>, #tpu.dimension_semantics<parallel>], iteration_bounds = array<i64: 2, 1>, scalar_prefetch = 0 : i64, scratch_operands = 0 : i64, tpu.core_type = #tpu.core_type<tc>, window_params = [{transform_indices = @transform_0, window_bounds = array<i64: 1, 36, 256>}, {pipeline_mode = #tpu.pipeline_mode<synchronous>, transform_indices = @transform_1, window_bounds = array<i64: 8, 36>}, {pipeline_mode = #tpu.pipeline_mode<synchronous>, transform_indices = @transform_2, window_bounds = array<i64: 8, 1>}, {transform_indices = @transform_3, window_bounds = array<i64: 1, 8, 256>}]} {
    %c0 = arith.constant 0 : index
    %c0_0 = arith.constant 0 : index
    %0 = vector.load %arg3[%c0, %c0_0] : memref<8x36xbf16, #tpu.memory_space<vmem>>, vector<8x36xbf16>
    %c0_1 = arith.constant 0 : index
    %c0_2 = arith.constant 0 : index
    %c0_3 = arith.constant 0 : index
    %1 = vector.load %arg2[%c0_1, %c0_2, %c0_3] : memref<1x36x256xbf16, #tpu.memory_space<vmem>>, vector<1x36x256xbf16>
    %2 = vector.shape_cast %1 : vector<1x36x256xbf16> to vector<36x256xbf16>
    %cst = arith.constant dense<0.000000e+00> : vector<8x256xf32>
    %3 = tpu.matmul %0, %2, %cst {dimension_numbers = #tpu.dot_dimension_numbers<[1], [0], [0], [1], [0, 0, 1, 1], [], []>} : vector<8x36xbf16>, vector<36x256xbf16>, vector<8x256xf32> -> vector<8x256xf32>
    %c0_4 = arith.constant 0 : index
    %c0_5 = arith.constant 0 : index
    %4 = vector.load %arg4[%c0_4, %c0_5] : memref<8x1xf32, #tpu.memory_space<vmem>>, vector<8x1xf32>
    %5 = vector.broadcast %4 : vector<8x1xf32> to vector<8x256xf32>
    %6 = arith.addf %3, %5 : vector<8x256xf32>
    %c0_6 = arith.constant 0 : index
    %c0_7 = arith.constant 0 : index
    %c0_8 = arith.constant 0 : index
    %7 = vector.load %arg5[%c0_6, %c0_7, %c0_8] : memref<1x8x256xf32, #tpu.memory_space<vmem>>, vector<1x8x256xf32>
    %8 = vector.shape_cast %7 : vector<1x8x256xf32> to vector<8x256xf32>
    %9 = vector.shape_cast %6 : vector<8x256xf32> to vector<1x8x256xf32>
    tpu.vector_store %arg5[%c0_6, %c0_7, %c0_8], %9 {strides = array<i32>} : memref<1x8x256xf32, #tpu.memory_space<vmem>>, vector<1x8x256xf32>,
    return
  }
  func.func @transform_0(%arg0: i32, %arg1: i32) -> (i32, i32, i32) {
    %c0_i32 = arith.constant 0 : i32
    %c0_i32_0 = arith.constant 0 : i32
    return %arg0, %c0_i32, %arg1 : i32, i32, i32
  }
  func.func @transform_1(%arg0: i32, %arg1: i32) -> (i32, i32) {
    %c0_i32 = arith.constant 0 : i32
    %c0_i32_0 = arith.constant 0 : i32
    %c0_i32_1 = arith.constant 0 : i32
    return %c0_i32, %c0_i32_0 : i32, i32
  }
  func.func @transform_2(%arg0: i32, %arg1: i32) -> (i32, i32) {
    %c0_i32 = arith.constant 0 : i32
    %c0_i32_0 = arith.constant 0 : i32
    %c0_i32_1 = arith.constant 0 : i32
    return %c0_i32, %c0_i32_0 : i32, i32
  }
  func.func @transform_3(%arg0: i32, %arg1: i32) -> (i32, i32, i32) {
    %c0_i32 = arith.constant 0 : i32
    %c0_i32_0 = arith.constant 0 : i32
    return %arg0, %c0_i32, %arg1 : i32, i32, i32
  }
}

</mosaic_0001>

<bundles_post_ra>
// kernel: tpu_custom_call.1
= control target key start
LH: loop header
LB: loop body
LE: loop exit
PB: predicated region body
PF: predicated region fallthrough
CT: control target
= control target key end

     0   :  { %8 = vsyncpa [#allocation3], 0  ;;  %s669_s0 = inlined_call_operand.vmem [shape: bf16[2,36,256], index: 0, kind: input, shape index: {}]   ;;  %s670_s1 = inlined_call_operand.vmem [shape: bf16[8,36], index: 1, kind: input, shape index: {}]   ;;  %s671_s2 = inlined_call_operand.vmem [shape: f32[8,1], index: 2, kind: input, shape index: {}]   ;;  %s672_s3 = inlined_call_operand.hbm [shape: f32[2,8,256], index: 3, kind: output, shape index: {}]  }
   0x1   :  { %10 = vsyncpa [#allocation3 + $0x1], 0  ;;  %s566_s12 = smov 0   ;;  %s568_s13 = smov 0  }
   0x2   :  { %s570_s14 = smov 0   ;;  %s572_s15 = smov 0  }
   0x3   :  { %s574_s16 = smov 0   ;;  %s576_s17 = smov 0  }
   0x4 LB: > { %s372_s18 = sadd.s32 4294967295, %s543_s17   ;;  %s373_s19 = sadd.s32 4294967294, %s543_s17   ;;  %s543_s17 = sphi %s576_s17, %s16_s17   ;;  %s539_s16 = sphi %s574_s16, %s679_s16   ;;  %s535_s15 = sphi %s572_s15, %s678_s15   ;;  %s531_s14 = sphi %s570_s14, %s677_s14   ;;  %s527_s13 = sphi %s568_s13, %s676_s13   ;;  %s523_s12 = sphi %s566_s12, %s675_s12  }
   0x5   : > { %s28_s20 = sadd.s32 1, %s539_s16  ;;  %s107_s21 = sadd.s32 1, %s531_s14 }
   0x6   : > { %p30_p0 = scmp.ge.s32.totalorder %s28_s20, 2  ;;  %p117_p1 = scmp.ne.s32.totalorder %s531_s14, %s527_s13 }
   0x7   : > { %p118_p2 = scmp.eq.s32.totalorder %s372_s18, 1  ;;  %p123_p3 = scmp.ne.s32.totalorder %s527_s13, %s523_s12 }
   0x8   : > { %s681_s20 = smov (%p30_p0, %s28_s20), 0  ;;  %p124_p5 = scmp.eq.s32.totalorder %s373_s19, 1 }
   0x9   : > { %p606_p4 = por %p118_p2, %p117_p1  ;;  %s102_s23 = ssub.s32 %s539_s16, %s681_s20 }
   0xa   : > { %p376_p6 = scmp.ge.s32.totalorder %s543_s17, 1  ;;  %p105_p7 = scmp.eq.s32.totalorder %s102_s23, 0 }
   0xb   : > { %p613_p8 = por %p124_p5, %p123_p3  ;;  %p161_p9 = scmp.lt.s32.totalorder %s543_s17, 3 }
   0xc   : > { %s619_s25 = scalar_select %p105_p7, %s531_s14, %s107_s21  }
   0xd   : > { %p162_p10 = pnand %p376_p6, %p161_p9 }
   0xe   : > { %p190_p11 = scmp.lt.s32.totalorder (!%p162_p10), %s535_s15, 1  ;;  %s186_s8 = sand.u32 (!%p162_p10), 1, %s527_s13  }
   0xf   : > { %165 = sbr.rel (%p162_p10) target bundleno = 176 (0xb0), region = 32  ;;  %s406_s9 = sshll.u32 (!%p162_p10), %s535_s15, 4 }
  0x10   : > { %s377_s10 = sshll.u32 (!%p162_p10), %s186_s8, 4  ;;  %s291_s19 = scalar_lea.hbm (!%p162_p10), %s672_s3, %s406_s9 }
  0x11   : > { %s188_s21 = scalar_lea.vmem (!%p162_p10), [#allocation2], %s377_s10  ;;  %s295_s26 = sshll.u32 (!%p162_p10), %s291_s19, 4  ;;  %s296_s26 = int_to_ptr.hbm [resolvable:$true] %s295_s26 }
  0x12   : > { %s293_s23 = sshll.u32 (!%p162_p10), %s188_s21, 4  ;;  %s278_s27 = scalar_lea.sflag (!%p162_p10), [#allocation3], %s186_s8  ;;  %s294_s23 = int_to_ptr.vmem [resolvable:$true] %s293_s23 }
  0x13   : > { %s485_s4 = scalar_lea.hbm (!%p162_p10), %s672_s3, 32 }
  0x14   : > { %v545_v0 = vmov 0   ;;  %v207_v1 = vld [vmem:[%s671_s2] sm:$0xff]  ;;  %s191_s28 = scalar_select %p190_p11, %s535_s15, 1  ;;  %vm242_vm0 = vcmask 1041408   ;;  %vm238_vm1 = vcmask 293888  }
  0x15   : > { %464 = vset.pattern.permute.xlu0 %v545_v0  ;;  %v201_v21 = vld [vmem:[%s670_s1] sm:$0xf]  ;;  %s479_s15 = sshra.s32 %s296_s26, 4  ;;  %s480_s15 = int_to_ptr.hbm [resolvable:$true] %s479_s15 }
  0x16   : > { %210 = vperm.xlu0 %464, %v207_v1   ;;  %s407_s29 = smul.u32 40, %s191_s28  ;;  %s481_s28 = scalar_lea.hbm %s480_s15, 16 }
  0x17   : > { %p482_p12 = scmp.ne.s32.totalorder %s480_s15, %s481_s28  ;;  %p486_p1 = scmp.lt.s32.totalorder %s480_s15, %s672_s3 }
  0x18   : > { %s197_s5 = scalar_lea.vmem %s669_s0, %s407_s29  ;;  %p487_p2 = scmp.lt.s32.totalorder %s485_s4, %s481_s28 }
  0x19   : > { %v206_v2 = vld [vmem:[%s197_s5 + $0x20] sm:$0x33]  ;;  %v389_v5 = vld [vmem:[%s197_s5 + $0x10] sm:$0xf]  ;;  %v405_v8 = vld [vmem:[%s197_s5 + $0x14] sm:$0xf0]  ;;  %p483_p13 = pnand %p482_p12, %p606_p4 }
  0x1a   : > { %v226_v3 = vunpack.c.l.b16 %v206_v2  ;;  %v227_v4 = vunpack.c.h.b16 %v206_v2  ;;  %v404_v9 = vld [vmem:[%s197_s5 + $0x14] sm:$0xf]  ;;  %v391_v10 = vld [vmem:[%s197_s5 + $0x18] sm:$0xf0]  ;;  %v390_v13 = vor.u32 %v405_v8, %v389_v5  ;;  %v381_v15 = vld [vmem:[%s197_s5] sm:$0xf]  ;;  %p488_p3 = por %p487_p2, %p486_p1 }
  0x1b   : > { %v394_v14 = vor.u32 %v404_v9, %v391_v10  ;;  %v403_v16 = vld [vmem:[%s197_s5 + $0x4] sm:$0xf0]  ;;  %v402_v17 = vld [vmem:[%s197_s5 + $0x4] sm:$0xf]  ;;  %v383_v18 = vld [vmem:[%s197_s5 + $0x8] sm:$0xf0]  ;;  %p484_p0 = pneg %p483_p13 }
  0x1c   : > { %v232_v6 = vpack.c.b16 %v226_v3, %v226_v3  ;;  %v233_v7 = vpack.c.b16 %v227_v4, %v227_v4  ;;  %v382_v19 = vor.u32 %v403_v16, %v381_v15  ;;  %v386_v20 = vor.u32 %v402_v17, %v383_v18 }
  0x1d   : > { %p489_p5 = pnand %p488_p3, %p484_p0 }
  0x1e   : > { %v244_v11 = vsel %vm242_vm0, %v232_v6, 0  ;;  %v247_v12 = vsel %vm242_vm0, %v233_v7, 0 }
  0x1f   : > { %254 = vmatpush.bf16.msra.mxu0 %v244_v11  ;;  %267 = vmatpush.bf16.msra.mxu1 %v247_v12 }
  0x23   : > { %255 = vmatpush.bf16.msra.mxu0 %v390_v13  ;;  %268 = vmatpush.bf16.msra.mxu1 %v394_v14 }
  0x27   : > { %256 = vmatpush.bf16.msra.mxu0 %v382_v19  ;;  %269 = vmatpush.bf16.msra.mxu1 %v386_v20 }
  0x2a   : > { %395 = vmatmul.msk.bf16.vlgmr.msra.gmra.mxu0 %vm238_vm1, %v201_v21  ;;  %396 = vmatmul.msk.bf16.vlgmr.msra.gmra.mxu1 %vm238_vm1, %v201_v21 }
  0x88   : > { %v211_v22 = vpop.permute.xlu0 %210 }
  0xa7   : > { %v258_v23 = vpop.f32.mrf.mxu0  ;;  %v271_v24 = vpop.f32.mrf.mxu1 }
  0xa8   : > { %v259_v25 = vadd.f32 %v258_v23, %v211_v22  ;;  %v272_v26 = vadd.f32 %v271_v24, %v211_v22 }
  0xaa   : > { %275 = vst [vmem:[%s188_s21] sm:$0xff] %v259_v25 }
  0xab   : > { %276 = vst [vmem:[%s188_s21 + $0x8] sm:$0xff] %v272_v26 }
  0xac   : > { %492 = shalt.err (!%p489_p5)
}
  0xad   : > { %408 = dma.vmem_to_hbm [thread:$0]  (%p606_p4), %s294_s23, 256, %s296_s26, %s278_s27  }
  0xaf   : > { %v260_v27 = vpop.f32.mrf.mxu0  ;;  %v273_v28 = vpop.f32.mrf.mxu1 }
  0xb0 PF: > { %p414_p6 = scmp.ge.s32.totalorder %s543_s17, 2  ;;  %s307_s7 = sand.u32 1, %s523_s12  }
  0xb1   : > { %s308_s8 = scalar_lea.sflag [#allocation3], %s307_s7 }
  0xb2   : > { %p411_p7 = pnand %p414_p6, %p613_p8 }
  0xb4   : > { %p412_p9 = pneg %p411_p7 }
  0xb6   : > { %518 = dma.done.wait (%p412_p9), %s308_s8, 256  }
  0xb7   : > { %520 = vsyncadd (%p412_p9), %s308_s8, 4294967040  ;;  %s16_s17 = sadd.s32 1, %s543_s17   ;;  %s675_s12 = smov %s527_s13 }
  0xb8   : > { %p13_p10 = scmp.ge.s32.totalorder %s16_s17, 4   ;;  %s676_s13 = smov %s531_s14 }
  0xb9   : > { %s677_s14 = smov %s619_s25  ;;  %s678_s15 = smov %s539_s16 }
  0xba   : > { %s679_s16 = smov %s681_s20  ;;  %15 = sbr.rel (!%p13_p10) target bundleno = 4 (0x4), region = 67 }
  0xbf   :  { %314 = vsyncpa [#allocation3], 1 }
  0xc0   :  { %316 = vsyncpa [#allocation3 + $0x1], 1 }

</bundles_post_ra>
